<compile_context>
chip_gen: v5e
topology: v5e:2x2
jax: 0.10.0
libtpu: 0.0.40
codegen_flags: <defaults>
</compile_context>

<pallas_src>
import functools

import jax
import jax.numpy as jnp
from jax.experimental import pallas as pl
from jax.experimental.pallas import tpu as pltpu


# ---------------------------------------------------------------------------
# Kernel body
# ---------------------------------------------------------------------------
def _sdpa_flash_kernel(*refs, has_proj: bool, n_valid: int, tile_k: int,
                       scale: float):
    if has_proj:
        (xq_ref, xk_ref, wp_ref, bp_ref, wq_ref, wkv_ref,
         w1_ref, b1_ref, w2_ref, b2_ref,
         o_ref, xp_sc, q_sc, m_sc, l_sc, acc_sc) = refs
    else:
        (xq_ref, xk_ref, wq_ref, wkv_ref,
         w1_ref, b1_ref, w2_ref, b2_ref,
         o_ref, xp_sc, q_sc, m_sc, l_sc, acc_sc) = refs
        wp_ref = bp_ref = None

    cdt = wq_ref.dtype                    # matmul operand ("compute") dtype
    d = q_sc.shape[-1]
    ki = pl.program_id(1)

    def project(x_raw):
        """Optional input projection; result kept in f32 for the residual path."""
        if has_proj:
            return (jnp.dot(x_raw.astype(cdt), wp_ref[...],
                            preferred_element_type=jnp.float32)
                    + bp_ref[...].astype(jnp.float32))
        return x_raw.astype(jnp.float32)

    # --- query-tile work: once per query tile (resident across the KV axis) ---
    @pl.when(ki == 0)
    def _init():
        xp = project(xq_ref[...])
        xp_sc[...] = xp
        q_sc[...] = jnp.dot(xp.astype(cdt), wq_ref[...],
                            preferred_element_type=jnp.float32)
        m_sc[...] = jnp.full_like(m_sc, -1e30)
        l_sc[...] = jnp.zeros_like(l_sc)
        acc_sc[...] = jnp.zeros_like(acc_sc)

    # --- per-KV-tile work: fused K/V projection + online softmax update -------
    xpk = project(xk_ref[...])
    kv = jnp.dot(xpk.astype(cdt), wkv_ref[...],
                 preferred_element_type=jnp.float32)          # (Tk, 2D) fused
    k = kv[:, :d]
    v = kv[:, d:]

    # contract last dims of Q and K: no materialized k.T (no XLU transpose)
    s = jax.lax.dot_general(
        q_sc[...].astype(cdt), k.astype(cdt),
        (((1,), (1,)), ((), ())),
        preferred_element_type=jnp.float32) * scale

    # mask padded KV columns (tail tile when N is not a tile multiple)
    kv_idx = ki * tile_k + jax.lax.broadcasted_iota(jnp.int32, s.shape, 1)
    s = jnp.where(kv_idx < n_valid, s, jnp.float32(-1e30))

    m_prev = m_sc[...]
    m_new = jnp.maximum(m_prev, jnp.max(s, axis=-1, keepdims=True))
    alpha = jnp.exp(m_prev - m_new)
    p = jnp.exp(s - m_new)
    l_sc[...] = alpha * l_sc[...] + jnp.sum(p, axis=-1, keepdims=True)
    acc_sc[...] = alpha * acc_sc[...] + jnp.dot(
        p.astype(cdt), v.astype(cdt), preferred_element_type=jnp.float32)
    m_sc[...] = m_new

    # --- finalize: softmax normalize + residual + FFN + residual --------------
    @pl.when(ki == pl.num_programs(1) - 1)
    def _finalize():
        xp = xp_sc[...]
        # Exact divide: runs once per query tile over a (tile, D) block, so the
        # VALU cost is negligible; the approximate EUP reciprocal previously used
        # here introduced error that the FFN amplified past tolerance.
        h = acc_sc[...] / l_sc[...]
        z = h + xp
        h1 = jnp.maximum(
            jnp.dot(z.astype(cdt), w1_ref[...], preferred_element_type=jnp.float32)
            + b1_ref[...].astype(jnp.float32), 0.0)
        out = (jnp.dot(h1.astype(cdt), w2_ref[...],
                       preferred_element_type=jnp.float32)
               + b2_ref[...].astype(jnp.float32))
        o_ref[...] = (out + xp).astype(o_ref.dtype)


# ---------------------------------------------------------------------------
# Wrapper
# ---------------------------------------------------------------------------
def _round_up(a, b):
    return (a + b - 1) // b * b


def sdpa_layer_forward(x, params, *, tile_n=256, compute_dtype=None,
                       interpret=False):
    """Pallas implementation of SDPA_layer.forward for X of shape (N, input_dim).

    compute_dtype: dtype of MXU matmul operands (default: x.dtype).  Pass
    jnp.bfloat16 on v6e/v7x for the fast MXU path; accumulation and the softmax
    statistics stay in f32 either way.
    """
    n, d_in = x.shape
    d = params["wq"].shape[-1]
    has_proj = params.get("wp") is not None
    cdt = compute_dtype if compute_dtype is not None else x.dtype

    # Row tile: multiple of 8 (sublane); padded N is a multiple of the tile.
    tile = min(_round_up(tile_n, 8), _round_up(n, 8))
    n_pad = _round_up(n, tile)
    x_p = jnp.pad(x, ((0, n_pad - n), (0, 0))) if n_pad != n else x
    grid = (n_pad // tile, n_pad // tile)
    n_q = grid[0]

    # Weights: fused [K|V] projection matrix; matmul operands in compute dtype,
    # biases kept in f32.
    wq = params["wq"].astype(cdt)
    wkv = jnp.concatenate([params["wk"], params["wv"]], axis=-1).astype(cdt)
    w1 = params["w1"].astype(cdt)
    w2 = params["w2"].astype(cdt)
    b1 = params["b1"].astype(jnp.float32)
    b2 = params["b2"].astype(jnp.float32)

    # Constant index maps -> weights are DMA'd once and stay VMEM-resident.
    def const_spec(arr):
        return pl.BlockSpec(arr.shape, lambda qi, ki: (0, 0))

    xq_spec = pl.BlockSpec((tile, d_in), lambda qi, ki: (qi, 0))
    xk_spec = pl.BlockSpec((tile, d_in), lambda qi, ki: (ki, 0))
    out_spec = pl.BlockSpec((tile, d), lambda qi, ki: (qi, 0))

    if has_proj:
        wp = params["wp"].astype(cdt)
        bp = params["bp"].astype(jnp.float32)
        args = (x_p, x_p, wp, bp, wq, wkv, w1, b1, w2, b2)
        in_specs = [xq_spec, xk_spec, const_spec(wp), const_spec(bp),
                    const_spec(wq), const_spec(wkv), const_spec(w1),
                    const_spec(b1), const_spec(w2), const_spec(b2)]
    else:
        args = (x_p, x_p, wq, wkv, w1, b1, w2, b2)
        in_specs = [xq_spec, xk_spec, const_spec(wq), const_spec(wkv),
                    const_spec(w1), const_spec(b1), const_spec(w2),
                    const_spec(b2)]

    kernel = functools.partial(
        _sdpa_flash_kernel, has_proj=has_proj, n_valid=n, tile_k=tile,
        scale=1.0 / float(d) ** 0.5)

    # Rough cost estimate so XLA can schedule/overlap around the custom call.
    itemsize = jnp.dtype(x.dtype).itemsize
    flops = (
        (2 * n_pad * d_in * d * (1 + n_q) if has_proj else 0)   # input proj
        + 2 * n_pad * d * d                                      # Q proj
        + 2 * n_pad * d * (2 * d) * n_q                          # fused K/V proj
        + 4 * n_pad * n_pad * d                                  # QK^T and P@V
        + 4 * n_pad * d * d                                      # 2-layer FFN
    )
    bytes_accessed = (
        x_p.size * itemsize * (1 + n_q)
        + sum(int(a.size) * jnp.dtype(a.dtype).itemsize for a in args[2:])
        + n_pad * d * itemsize
    )
    cost = pl.CostEstimate(
        flops=int(flops),
        transcendentals=int(n_pad * n_pad + 2 * n_pad * n_q),
        bytes_accessed=int(bytes_accessed))

    out = pl.pallas_call(
        kernel,
        out_shape=jax.ShapeDtypeStruct((n_pad, d), x.dtype),
        grid=grid,
        in_specs=in_specs,
        out_specs=out_spec,
        scratch_shapes=[
            pltpu.VMEM((tile, d), jnp.float32),  # projected query-tile input (residual)
            pltpu.VMEM((tile, d), jnp.float32),  # Q tile
            pltpu.VMEM((tile, 1), jnp.float32),  # running max
            pltpu.VMEM((tile, 1), jnp.float32),  # running denom
            pltpu.VMEM((tile, d), jnp.float32),  # output accumulator
        ],
        compiler_params=pltpu.CompilerParams(
            dimension_semantics=("parallel", "arbitrary"),
            vmem_limit_bytes=32 * 1024 * 1024),
        cost_estimate=cost,
        interpret=interpret,
    )(*args)

    return out[:n]


# ---------------------------------------------------------------------------
# Deterministic parameter init (mirrors the PyTorch __init__ shapes)
# ---------------------------------------------------------------------------
def init_params(key, input_dim, output_dim):
    keys = jax.random.split(key, 4)

    def kaiming_uniform(k, fan_in, fan_out):
        # kaiming_uniform_(nonlinearity='relu'): bound = sqrt(6 / fan_in)
        bound = float(jnp.sqrt(6.0 / fan_in))
        return jax.random.uniform(k, (fan_in, fan_out), jnp.float32, -bound, bound)

    params = {}
    if input_dim != output_dim:
        params["wp"] = kaiming_uniform(keys[0], input_dim, output_dim)
        params["bp"] = jnp.zeros((1, output_dim), jnp.float32)  # zeroed by initialize_weights
    else:
        params["wp"] = None
        params["bp"] = None

    # qkv_mlp: Linear(output_dim, 3*output_dim, bias=False) -> split Q/K/V columns
    wqkv = kaiming_uniform(keys[1], output_dim, 3 * output_dim)
    params["wq"] = wqkv[:, 0 * output_dim:1 * output_dim]
    params["wk"] = wqkv[:, 1 * output_dim:2 * output_dim]
    params["wv"] = wqkv[:, 2 * output_dim:3 * output_dim]

    # FeedForwardNetwork(output_dim, output_dim, output_dim, 2): Linear -> ReLU -> Linear
    params["w1"] = kaiming_uniform(keys[2], output_dim, output_dim)
    params["b1"] = jnp.zeros((1, output_dim), jnp.float32)
    params["w2"] = kaiming_uniform(keys[3], output_dim, output_dim)
    params["b2"] = jnp.zeros((1, output_dim), jnp.float32)
    return params


# Pure-JAX reference (same math) for a correctness check.
def reference_forward(x, params):
    x = x.astype(jnp.float32)
    if params["wp"] is not None:
        x = x @ params["wp"] + params["bp"]
    q = x @ params["wq"]
    k = x @ params["wk"]
    v = x @ params["wv"]
    s = (q @ k.T) / jnp.sqrt(jnp.float32(x.shape[-1]))
    p = jax.nn.softmax(s, axis=-1)
    h = p @ v
    z = h + x
    out = jnp.maximum(z @ params["w1"] + params["b1"], 0.0) @ params["w2"] + params["b2"]
    return out + x


if __name__ == "__main__":
    key = jax.random.PRNGKey(0)
    k_param, k_x = jax.random.split(key)

    N = 40            # nodes; not a tile multiple -> exercises KV tail masking
    input_dim = 64    # != output_dim, so the input-projection branch is exercised
    output_dim = 128  # lane-dense feature dim (multiple of 128)

    params = init_params(k_param, input_dim, output_dim)
    x = jax.random.normal(k_x, (N, input_dim), dtype=jnp.float32)

    # small tile so the demo runs a real 3x3 grid with online softmax + masking
    out = sdpa_layer_forward(x, params, tile_n=16)
    out = jax.block_until_ready(out)

    ref = reference_forward(x, params)
    assert out.shape == (N, output_dim)
    # Math is f32 end-to-end (exact softmax normalization), so the kernel tracks
    # the pure-JAX reference to ~1e-4; tolerance leaves headroom for accumulation
    # order differences.
    assert jnp.allclose(out, ref, atol=1e-2, rtol=1e-2), (
        f"mismatch vs reference (max abs err {jnp.max(jnp.abs(out - ref))})")

    print("KERNEL_OK")
</pallas_src>

<mosaic_0001>
module attributes {stable_mosaic.version = 11 : i64} {
  func.func @_sdpa_flash_kernel(%arg0: i32, %arg1: i32, %arg2: memref<16x64xf32, #tpu.memory_space<vmem>>, %arg3: memref<16x64xf32, #tpu.memory_space<vmem>>, %arg4: memref<64x128xf32, #tpu.memory_space<vmem>>, %arg5: memref<1x128xf32, #tpu.memory_space<vmem>>, %arg6: memref<128x128xf32, #tpu.memory_space<vmem>>, %arg7: memref<128x256xf32, #tpu.memory_space<vmem>>, %arg8: memref<128x128xf32, #tpu.memory_space<vmem>>, %arg9: memref<1x128xf32, #tpu.memory_space<vmem>>, %arg10: memref<128x128xf32, #tpu.memory_space<vmem>>, %arg11: memref<1x128xf32, #tpu.memory_space<vmem>>, %arg12: memref<16x128xf32, #tpu.memory_space<vmem>>, %arg13: memref<16x128xf32, #tpu.memory_space<vmem>>, %arg14: memref<16x128xf32, #tpu.memory_space<vmem>>, %arg15: memref<16x1xf32, #tpu.memory_space<vmem>>, %arg16: memref<16x1xf32, #tpu.memory_space<vmem>>, %arg17: memref<16x128xf32, #tpu.memory_space<vmem>>) attributes {dimension_semantics = [#tpu.dimension_semantics<parallel>, #tpu.dimension_semantics<arbitrary>], iteration_bounds = array<i64: 3, 3>, scalar_prefetch = 0 : i64, scratch_operands = 5 : i64, tpu.core_type = #tpu.core_type<tc>, window_params = [{transform_indices = @transform_0, window_bounds = array<i64: 16, 64>}, {transform_indices = @transform_1, window_bounds = array<i64: 16, 64>}, {pipeline_mode = #tpu.pipeline_mode<synchronous>, transform_indices = @transform_2, window_bounds = array<i64: 64, 128>}, {pipeline_mode = #tpu.pipeline_mode<synchronous>, transform_indices = @transform_3, window_bounds = array<i64: 1, 128>}, {pipeline_mode = #tpu.pipeline_mode<synchronous>, transform_indices = @transform_4, window_bounds = array<i64: 128, 128>}, {pipeline_mode = #tpu.pipeline_mode<synchronous>, transform_indices = @transform_5, window_bounds = array<i64: 128, 256>}, {pipeline_mode = #tpu.pipeline_mode<synchronous>, transform_indices = @transform_6, window_bounds = array<i64: 128, 128>}, {pipeline_mode = #tpu.pipeline_mode<synchronous>, transform_indices = @transform_7, window_bounds = array<i64: 1, 128>}, {pipeline_mode = #tpu.pipeline_mode<synchronous>, transform_indices = @transform_8, window_bounds = array<i64: 128, 128>}, {pipeline_mode = #tpu.pipeline_mode<synchronous>, transform_indices = @transform_9, window_bounds = array<i64: 1, 128>}, {transform_indices = @transform_10, window_bounds = array<i64: 16, 128>}]} {
    %c0_i32 = arith.constant 0 : i32
    %0 = arith.cmpi eq, %arg1, %c0_i32 : i32
    %1 = arith.extui %0 : i1 to i32
    %c0_i32_0 = arith.constant 0 : i32
    %2 = arith.cmpi ne, %1, %c0_i32_0 : i32
    scf.if %2 {
      %c0_30 = arith.constant 0 : index
      %c0_31 = arith.constant 0 : index
      %50 = vector.load %arg2[%c0_30, %c0_31] : memref<16x64xf32, #tpu.memory_space<vmem>>, vector<16x64xf32>
      %c0_32 = arith.constant 0 : index
      %c0_33 = arith.constant 0 : index
      %51 = vector.load %arg4[%c0_32, %c0_33] : memref<64x128xf32, #tpu.memory_space<vmem>>, vector<64x128xf32>
      %cst_34 = arith.constant dense<0.000000e+00> : vector<16x128xf32>
      %52 = tpu.matmul %50, %51, %cst_34 {dimension_numbers = #tpu.dot_dimension_numbers<[1], [0], [0], [1], [0, 0, 1, 1], [], []>} : vector<16x64xf32>, vector<64x128xf32>, vector<16x128xf32> -> vector<16x128xf32>
      %c0_35 = arith.constant 0 : index
      %c0_36 = arith.constant 0 : index
      %53 = vector.load %arg5[%c0_35, %c0_36] : memref<1x128xf32, #tpu.memory_space<vmem>>, vector<1x128xf32>
      %54 = vector.broadcast %53 : vector<1x128xf32> to vector<16x128xf32>
      %55 = arith.addf %52, %54 : vector<16x128xf32>
      %c0_37 = arith.constant 0 : index
      %c0_38 = arith.constant 0 : index
      %56 = vector.load %arg13[%c0_37, %c0_38] : memref<16x128xf32, #tpu.memory_space<vmem>>, vector<16x128xf32>
      tpu.vector_store %arg13[%c0_37, %c0_38], %55 {strides = array<i32>} : memref<16x128xf32, #tpu.memory_space<vmem>>, vector<16x128xf32>,
      %c0_39 = arith.constant 0 : index
      %c0_40 = arith.constant 0 : index
      %57 = vector.load %arg6[%c0_39, %c0_40] : memref<128x128xf32, #tpu.memory_space<vmem>>, vector<128x128xf32>
      %cst_41 = arith.constant dense<0.000000e+00> : vector<16x128xf32>
      %58 = tpu.matmul %55, %57, %cst_41 {dimension_numbers = #tpu.dot_dimension_numbers<[1], [0], [0], [1], [0, 0, 1, 1], [], []>} : vector<16x128xf32>, vector<128x128xf32>, vector<16x128xf32> -> vector<16x128xf32>
      %c0_42 = arith.constant 0 : index
      %c0_43 = arith.constant 0 : index
      %59 = vector.load %arg14[%c0_42, %c0_43] : memref<16x128xf32, #tpu.memory_space<vmem>>, vector<16x128xf32>
      tpu.vector_store %arg14[%c0_42, %c0_43], %58 {strides = array<i32>} : memref<16x128xf32, #tpu.memory_space<vmem>>, vector<16x128xf32>,
      %cst_44 = arith.constant -1.000000e+30 : f32
      %60 = vector.broadcast %cst_44 : f32 to vector<16x1xf32>
      %c0_45 = arith.constant 0 : index
      %c0_46 = arith.constant 0 : index
      %61 = vector.load %arg15[%c0_45, %c0_46] : memref<16x1xf32, #tpu.memory_space<vmem>>, vector<16x1xf32>
      tpu.vector_store %arg15[%c0_45, %c0_46], %60 {strides = array<i32>} : memref<16x1xf32, #tpu.memory_space<vmem>>, vector<16x1xf32>,
      %cst_47 = arith.constant 0.000000e+00 : f32
      %62 = vector.broadcast %cst_47 : f32 to vector<16x1xf32>
      %c0_48 = arith.constant 0 : index
      %c0_49 = arith.constant 0 : index
      %63 = vector.load %arg16[%c0_48, %c0_49] : memref<16x1xf32, #tpu.memory_space<vmem>>, vector<16x1xf32>
      tpu.vector_store %arg16[%c0_48, %c0_49], %62 {strides = array<i32>} : memref<16x1xf32, #tpu.memory_space<vmem>>, vector<16x1xf32>,
      %cst_50 = arith.constant 0.000000e+00 : f32
      %64 = vector.broadcast %cst_50 : f32 to vector<16x128xf32>
      %c0_51 = arith.constant 0 : index
      %c0_52 = arith.constant 0 : index
      %65 = vector.load %arg17[%c0_51, %c0_52] : memref<16x128xf32, #tpu.memory_space<vmem>>, vector<16x128xf32>
      tpu.vector_store %arg17[%c0_51, %c0_52], %64 {strides = array<i32>} : memref<16x128xf32, #tpu.memory_space<vmem>>, vector<16x128xf32>,
    } else {
    }
    %c0 = arith.constant 0 : index
    %c0_1 = arith.constant 0 : index
    %3 = vector.load %arg3[%c0, %c0_1] : memref<16x64xf32, #tpu.memory_space<vmem>>, vector<16x64xf32>
    %c0_2 = arith.constant 0 : index
    %c0_3 = arith.constant 0 : index
    %4 = vector.load %arg4[%c0_2, %c0_3] : memref<64x128xf32, #tpu.memory_space<vmem>>, vector<64x128xf32>
    %cst = arith.constant dense<0.000000e+00> : vector<16x128xf32>
    %5 = tpu.matmul %3, %4, %cst {dimension_numbers = #tpu.dot_dimension_numbers<[1], [0], [0], [1], [0, 0, 1, 1], [], []>} : vector<16x64xf32>, vector<64x128xf32>, vector<16x128xf32> -> vector<16x128xf32>
    %c0_4 = arith.constant 0 : index
    %c0_5 = arith.constant 0 : index
    %6 = vector.load %arg5[%c0_4, %c0_5] : memref<1x128xf32, #tpu.memory_space<vmem>>, vector<1x128xf32>
    %7 = vector.broadcast %6 : vector<1x128xf32> to vector<16x128xf32>
    %8 = arith.addf %5, %7 : vector<16x128xf32>
    %c0_6 = arith.constant 0 : index
    %c0_7 = arith.constant 0 : index
    %9 = vector.load %arg7[%c0_6, %c0_7] : memref<128x256xf32, #tpu.memory_space<vmem>>, vector<128x256xf32>
    %cst_8 = arith.constant dense<0.000000e+00> : vector<16x256xf32>
    %10 = tpu.matmul %8, %9, %cst_8 {dimension_numbers = #tpu.dot_dimension_numbers<[1], [0], [0], [1], [0, 0, 1, 1], [], []>} : vector<16x128xf32>, vector<128x256xf32>, vector<16x256xf32> -> vector<16x256xf32>
    %11 = vector.extract_strided_slice %10 {offsets = [0, 0], sizes = [16, 128], strides = [1, 1]} : vector<16x256xf32> to vector<16x128xf32>
    %12 = vector.extract_strided_slice %10 {offsets = [0, 128], sizes = [16, 128], strides = [1, 1]} : vector<16x256xf32> to vector<16x128xf32>
    %c0_9 = arith.constant 0 : index
    %c0_10 = arith.constant 0 : index
    %13 = vector.load %arg14[%c0_9, %c0_10] : memref<16x128xf32, #tpu.memory_space<vmem>>, vector<16x128xf32>
    %cst_11 = arith.constant dense<0.000000e+00> : vector<16x16xf32>
    %14 = tpu.matmul %13, %11, %cst_11 {dimension_numbers = #tpu.dot_dimension_numbers<[1], [1], [0], [0], [0, 0, 1, 0], [], []>} : vector<16x128xf32>, vector<16x128xf32>, vector<16x16xf32> -> vector<16x16xf32>
    %cst_12 = arith.constant 0.0883883461 : f32
    %15 = vector.broadcast %cst_12 : f32 to vector<16x16xf32>
    %16 = arith.mulf %14, %15 : vector<16x16xf32>
    %c16_i32 = arith.constant 16 : i32
    %17 = arith.muli %arg1, %c16_i32 : i32
    %18 = tpu.iota {dimensions = array<i32: 1>} : vector<16x16xi32>
    %19 = vector.broadcast %17 : i32 to vector<16x16xi32>
    %20 = arith.addi %19, %18 : vector<16x16xi32>
    %c40_i32 = arith.constant 40 : i32
    %21 = vector.broadcast %c40_i32 : i32 to vector<16x16xi32>
    %22 = arith.cmpi slt, %20, %21 : vector<16x16xi32>
    %cst_13 = arith.constant -1.000000e+30 : f32
    %23 = vector.broadcast %cst_13 : f32 to vector<16x16xf32>
    %24 = arith.select %22, %16, %23 : vector<16x16xi1>, vector<16x16xf32>
    %c0_14 = arith.constant 0 : index
    %c0_15 = arith.constant 0 : index
    %25 = vector.load %arg15[%c0_14, %c0_15] : memref<16x1xf32, #tpu.memory_space<vmem>>, vector<16x1xf32>
    %cst_16 = arith.constant dense<0xFF800000> : vector<16xf32>
    %26 = vector.multi_reduction <maximumf>, %24, %cst_16 [1] : vector<16x16xf32> to vector<16xf32>
    %27 = vector.shape_cast %26 : vector<16xf32> to vector<16x1xf32>
    %28 = arith.maximumf %25, %27 : vector<16x1xf32>
    %29 = arith.subf %25, %28 : vector<16x1xf32>
    %30 = math.exp %29 : vector<16x1xf32>
    %31 = vector.broadcast %28 : vector<16x1xf32> to vector<16x16xf32>
    %32 = arith.subf %24, %31 : vector<16x16xf32>
    %33 = math.exp %32 : vector<16x16xf32>
    %c0_17 = arith.constant 0 : index
    %c0_18 = arith.constant 0 : index
    %34 = vector.load %arg16[%c0_17, %c0_18] : memref<16x1xf32, #tpu.memory_space<vmem>>, vector<16x1xf32>
    %35 = arith.mulf %30, %34 : vector<16x1xf32>
    %cst_19 = arith.constant dense<0.000000e+00> : vector<16xf32>
    %36 = vector.multi_reduction <add>, %33, %cst_19 [1] : vector<16x16xf32> to vector<16xf32>
    %37 = vector.shape_cast %36 : vector<16xf32> to vector<16x1xf32>
    %38 = arith.addf %35, %37 : vector<16x1xf32>
    %c0_20 = arith.constant 0 : index
    %c0_21 = arith.constant 0 : index
    %39 = vector.load %arg16[%c0_20, %c0_21] : memref<16x1xf32, #tpu.memory_space<vmem>>, vector<16x1xf32>
    tpu.vector_store %arg16[%c0_20, %c0_21], %38 {strides = array<i32>} : memref<16x1xf32, #tpu.memory_space<vmem>>, vector<16x1xf32>,
    %c0_22 = arith.constant 0 : index
    %c0_23 = arith.constant 0 : index
    %40 = vector.load %arg17[%c0_22, %c0_23] : memref<16x128xf32, #tpu.memory_space<vmem>>, vector<16x128xf32>
    %41 = vector.broadcast %30 : vector<16x1xf32> to vector<16x128xf32>
    %42 = arith.mulf %41, %40 : vector<16x128xf32>
    %cst_24 = arith.constant dense<0.000000e+00> : vector<16x128xf32>
    %43 = tpu.matmul %33, %12, %cst_24 {dimension_numbers = #tpu.dot_dimension_numbers<[1], [0], [0], [1], [0, 0, 1, 1], [], []>} : vector<16x16xf32>, vector<16x128xf32>, vector<16x128xf32> -> vector<16x128xf32>
    %44 = arith.addf %42, %43 : vector<16x128xf32>
    %c0_25 = arith.constant 0 : index
    %c0_26 = arith.constant 0 : index
    %45 = vector.load %arg17[%c0_25, %c0_26] : memref<16x128xf32, #tpu.memory_space<vmem>>, vector<16x128xf32>
    tpu.vector_store %arg17[%c0_25, %c0_26], %44 {strides = array<i32>} : memref<16x128xf32, #tpu.memory_space<vmem>>, vector<16x128xf32>,
    %c0_27 = arith.constant 0 : index
    %c0_28 = arith.constant 0 : index
    %46 = vector.load %arg15[%c0_27, %c0_28] : memref<16x1xf32, #tpu.memory_space<vmem>>, vector<16x1xf32>
    tpu.vector_store %arg15[%c0_27, %c0_28], %28 {strides = array<i32>} : memref<16x1xf32, #tpu.memory_space<vmem>>, vector<16x1xf32>,
    %c2_i32 = arith.constant 2 : i32
    %47 = arith.cmpi eq, %arg1, %c2_i32 : i32
    %48 = arith.extui %47 : i1 to i32
    %c0_i32_29 = arith.constant 0 : i32
    %49 = arith.cmpi ne, %48, %c0_i32_29 : i32
    scf.if %49 {
      %c0_30 = arith.constant 0 : index
      %c0_31 = arith.constant 0 : index
      %50 = vector.load %arg13[%c0_30, %c0_31] : memref<16x128xf32, #tpu.memory_space<vmem>>, vector<16x128xf32>
      %c0_32 = arith.constant 0 : index
      %c0_33 = arith.constant 0 : index
      %51 = vector.load %arg17[%c0_32, %c0_33] : memref<16x128xf32, #tpu.memory_space<vmem>>, vector<16x128xf32>
      %c0_34 = arith.constant 0 : index
      %c0_35 = arith.constant 0 : index
      %52 = vector.load %arg16[%c0_34, %c0_35] : memref<16x1xf32, #tpu.memory_space<vmem>>, vector<16x1xf32>
      %53 = vector.broadcast %52 : vector<16x1xf32> to vector<16x128xf32>
      %54 = arith.divf %51, %53 : vector<16x128xf32>
      %55 = arith.addf %54, %50 : vector<16x128xf32>
      %c0_36 = arith.constant 0 : index
      %c0_37 = arith.constant 0 : index
      %56 = vector.load %arg8[%c0_36, %c0_37] : memref<128x128xf32, #tpu.memory_space<vmem>>, vector<128x128xf32>
      %cst_38 = arith.constant dense<0.000000e+00> : vector<16x128xf32>
      %57 = tpu.matmul %55, %56, %cst_38 {dimension_numbers = #tpu.dot_dimension_numbers<[1], [0], [0], [1], [0, 0, 1, 1], [], []>} : vector<16x128xf32>, vector<128x128xf32>, vector<16x128xf32> -> vector<16x128xf32>
      %c0_39 = arith.constant 0 : index
      %c0_40 = arith.constant 0 : index
      %58 = vector.load %arg9[%c0_39, %c0_40] : memref<1x128xf32, #tpu.memory_space<vmem>>, vector<1x128xf32>
      %59 = vector.broadcast %58 : vector<1x128xf32> to vector<16x128xf32>
      %60 = arith.addf %57, %59 : vector<16x128xf32>
      %cst_41 = arith.constant 0.000000e+00 : f32
      %61 = vector.broadcast %cst_41 : f32 to vector<16x128xf32>
      %62 = arith.maximumf %60, %61 : vector<16x128xf32>
      %c0_42 = arith.constant 0 : index
      %c0_43 = arith.constant 0 : index
      %63 = vector.load %arg10[%c0_42, %c0_43] : memref<128x128xf32, #tpu.memory_space<vmem>>, vector<128x128xf32>
      %cst_44 = arith.constant dense<0.000000e+00> : vector<16x128xf32>
      %64 = tpu.matmul %62, %63, %cst_44 {dimension_numbers = #tpu.dot_dimension_numbers<[1], [0], [0], [1], [0, 0, 1, 1], [], []>} : vector<16x128xf32>, vector<128x128xf32>, vector<16x128xf32> -> vector<16x128xf32>
      %c0_45 = arith.constant 0 : index
      %c0_46 = arith.constant 0 : index
      %65 = vector.load %arg11[%c0_45, %c0_46] : memref<1x128xf32, #tpu.memory_space<vmem>>, vector<1x128xf32>
      %66 = vector.broadcast %65 : vector<1x128xf32> to vector<16x128xf32>
      %67 = arith.addf %64, %66 : vector<16x128xf32>
      %68 = arith.addf %67, %50 : vector<16x128xf32>
      %c0_47 = arith.constant 0 : index
      %c0_48 = arith.constant 0 : index
      %69 = vector.load %arg12[%c0_47, %c0_48] : memref<16x128xf32, #tpu.memory_space<vmem>>, vector<16x128xf32>
      tpu.vector_store %arg12[%c0_47, %c0_48], %68 {strides = array<i32>} : memref<16x128xf32, #tpu.memory_space<vmem>>, vector<16x128xf32>,
    } else {
    }
    return
  }
  func.func @transform_0(%arg0: i32, %arg1: i32) -> (i32, i32) {
    %c0_i32 = arith.constant 0 : i32
    %c0_i32_0 = arith.constant 0 : i32
    return %arg0, %c0_i32 : i32, i32
  }
  func.func @transform_1(%arg0: i32, %arg1: i32) -> (i32, i32) {
    %c0_i32 = arith.constant 0 : i32
    %c0_i32_0 = arith.constant 0 : i32
    return %arg1, %c0_i32 : i32, i32
  }
  func.func @transform_2(%arg0: i32, %arg1: i32) -> (i32, i32) {
    %c0_i32 = arith.constant 0 : i32
    %c0_i32_0 = arith.constant 0 : i32
    %c0_i32_1 = arith.constant 0 : i32
    return %c0_i32, %c0_i32_0 : i32, i32
  }
  func.func @transform_3(%arg0: i32, %arg1: i32) -> (i32, i32) {
    %c0_i32 = arith.constant 0 : i32
    %c0_i32_0 = arith.constant 0 : i32
    %c0_i32_1 = arith.constant 0 : i32
    return %c0_i32, %c0_i32_0 : i32, i32
  }
  func.func @transform_4(%arg0: i32, %arg1: i32) -> (i32, i32) {
    %c0_i32 = arith.constant 0 : i32
    %c0_i32_0 = arith.constant 0 : i32
    %c0_i32_1 = arith.constant 0 : i32
    return %c0_i32, %c0_i32_0 : i32, i32
  }
  func.func @transform_5(%arg0: i32, %arg1: i32) -> (i32, i32) {
    %c0_i32 = arith.constant 0 : i32
    %c0_i32_0 = arith.constant 0 : i32
    %c0_i32_1 = arith.constant 0 : i32
    return %c0_i32, %c0_i32_0 : i32, i32
  }
  func.func @transform_6(%arg0: i32, %arg1: i32) -> (i32, i32) {
    %c0_i32 = arith.constant 0 : i32
    %c0_i32_0 = arith.constant 0 : i32
    %c0_i32_1 = arith.constant 0 : i32
    return %c0_i32, %c0_i32_0 : i32, i32
  }
  func.func @transform_7(%arg0: i32, %arg1: i32) -> (i32, i32) {
    %c0_i32 = arith.constant 0 : i32
    %c0_i32_0 = arith.constant 0 : i32
    %c0_i32_1 = arith.constant 0 : i32
    return %c0_i32, %c0_i32_0 : i32, i32
  }
  func.func @transform_8(%arg0: i32, %arg1: i32) -> (i32, i32) {
    %c0_i32 = arith.constant 0 : i32
    %c0_i32_0 = arith.constant 0 : i32
    %c0_i32_1 = arith.constant 0 : i32
    return %c0_i32, %c0_i32_0 : i32, i32
  }
  func.func @transform_9(%arg0: i32, %arg1: i32) -> (i32, i32) {
    %c0_i32 = arith.constant 0 : i32
    %c0_i32_0 = arith.constant 0 : i32
    %c0_i32_1 = arith.constant 0 : i32
    return %c0_i32, %c0_i32_0 : i32, i32
  }
  func.func @transform_10(%arg0: i32, %arg1: i32) -> (i32, i32) {
    %c0_i32 = arith.constant 0 : i32
    %c0_i32_0 = arith.constant 0 : i32
    return %arg0, %c0_i32 : i32, i32
  }
}

</mosaic_0001>

<bundles_post_ra>
// kernel: tpu_custom_call.1
= control target key start
LH: loop header
LB: loop body
LE: loop exit
PB: predicated region body
PF: predicated region fallthrough
CT: control target
= control target key end

     0   :  { %s2210_s0 = inlined_call_operand.hbm [shape: f32[48,64], index: 0, kind: input, shape index: {}]   ;;  %s2211_s1 = inlined_call_operand.hbm [shape: f32[48,64], index: 1, kind: input, shape index: {}]   ;;  %s2212_s2 = inlined_call_operand.hbm [shape: f32[64,128], index: 2, kind: input, shape index: {}]   ;;  %s2213_s3 = inlined_call_operand.vmem [shape: f32[1,128], index: 3, kind: input, shape index: {}]   ;;  %s2214_s4 = inlined_call_operand.hbm [shape: f32[128,128], index: 4, kind: input, shape index: {}]   ;;  %s2215_s5 = inlined_call_operand.hbm [shape: f32[128,256], index: 5, kind: input, shape index: {}]   ;;  %s2216_s6 = inlined_call_operand.hbm [shape: f32[128,128], index: 6, kind: input, shape index: {}]   ;;  %s2217_s7 = inlined_call_operand.vmem [shape: f32[1,128], index: 7, kind: input, shape index: {}]   ;;  %s2218_s8 = inlined_call_operand.hbm [shape: f32[128,128], index: 8, kind: input, shape index: {}]   ;;  %s2219_s9 = inlined_call_operand.vmem [shape: f32[1,128], index: 9, kind: input, shape index: {}]   ;;  %s2220_s10 = inlined_call_operand.hbm [shape: f32[48,128], index: 10, kind: output, shape index: {}]  }
   0x1   :  { %2230 = sst [smem:[#allocation32_spill]] %s2210_s0 }
   0x2   :  { %2231 = sst [smem:[#allocation33_spill]] %s2212_s2 }
   0x3   :  { %2232 = sst [smem:[#allocation34_spill]] %s2213_s3 }
   0x4   :  { %2233 = sst [smem:[#allocation35_spill]] %s2214_s4 }
   0x5   :  { %2234 = sst [smem:[#allocation36_spill]] %s2215_s5 }
   0x6   :  { %2235 = sst [smem:[#allocation37_spill]] %s2216_s6 }
   0x7   :  { %2236 = sst [smem:[#allocation38_spill]] %s2217_s7 }
   0x8   :  { %2237 = sst [smem:[#allocation39_spill]] %s2218_s8 }
   0x9   :  { %2238 = sst [smem:[#allocation40_spill]] %s2219_s9 }
   0xa   :  { %2239 = sst [smem:[#allocation41_spill]] %s2220_s10 }
   0xb   :  { %15 = vsyncpa [#allocation8], 0 }
   0xc   :  { %17 = vsyncpa [#allocation8 + $0x1], 0 }
   0xd   :  { %18 = vsyncpa [#allocation11], 0 }
   0xe   :  { %20 = vsyncpa [#allocation11 + $0x1], 0 }
   0xf   :  { %21 = vsyncpa [#allocation14], 0 }
  0x10   :  { %22 = vsyncpa [#allocation17], 0 }
  0x11   :  { %23 = vsyncpa [#allocation9], 0 }
  0x12   :  { %25 = vsyncpa [#allocation9 + $0x1], 0  ;;  %s1882_s13 = smov 0   ;;  %s1884_s14 = smov 0  }
  0x13   :  { %s1886_s15 = smov 0   ;;  %s1888_s16 = smov 0  }
  0x14   :  { %s1890_s17 = smov 0   ;;  %s1892_s18 = smov 0  }
  0x15   :  { %s1894_s19 = smov 0   ;;  %s1896_s20 = smov 0  }
  0x16   :  { %s1898_s21 = smov 0   ;;  %s1900_s22 = smov 0  }
  0x17   :  { %s1902_s23 = smov 0  }
  0x18 LB: > { %2240 = sst [smem:[#allocation26_spill]] %s1782_s16  ;;  %s1938_s24 = sadd.s32 4294967295, %s1810_s23   ;;  %s1810_s23 = sphi %s1902_s23, %s31_s23   ;;  %s1806_s22 = sphi %s1900_s22, %s2285_s22   ;;  %s1802_s21 = sphi %s1898_s21, %s2284_s21   ;;  %s1798_s20 = sphi %s1896_s20, %s2283_s20   ;;  %s1794_s19 = sphi %s1894_s19, %s2282_s19   ;;  %s1790_s18 = sphi %s1892_s18, %s2281_s18   ;;  %s1786_s17 = sphi %s1890_s17, %s2280_s17   ;;  %s1782_s16 = sphi %s1888_s16, %s2279_s16   ;;  %s1778_s15 = sphi %s1886_s15, %s2278_s15   ;;  %s1774_s14 = sphi %s1884_s14, %s2277_s14   ;;  %s1770_s13 = sphi %s1882_s13, %s2276_s13  }
  0x19   : > { %2241 = sst [smem:[#allocation27_spill]] %s1794_s19  ;;  %p1187_p0 = scmp.ge.s32.totalorder %s1810_s23, 1 }
  0x1a   : > { %2242 = sst [smem:[#allocation28_spill]] %s1798_s20  ;;  %p64_p1 = scmp.eq.s32.totalorder %s1938_s24, 0 }
  0x1b   : > { %p294_p2 = scmp.lt.s32.totalorder %s1810_s23, 10  ;;  %s2243_s2 = sld [smem:[#allocation33_spill]] }
  0x1c   : > { %s1812_s29 = smov [#allocation12]   ;;  %s2246_s4 = sld [smem:[#allocation35_spill]] }
  0x1d   : > { %p1946_p3 = pnand %p1187_p0, %p294_p2  ;;  %s307_s30 = sshll.u32 %s1812_s29, 4  ;;  %s308_s30 = int_to_ptr.vmem [resolvable:$true] %s307_s30 }
  0x1e   : > { %s2223_s26 = smov 128   ;;  %s1815_s29 = smov [#allocation13]  }
  0x1f   : > { %p1300_p4 = pneg %p1946_p3  ;;  %s324_s20 = sshll.u32 %s1815_s29, 4  ;;  %s325_s20 = int_to_ptr.vmem [resolvable:$true] %s324_s20 }
  0x20   : > { %s2247_s6 = sld [smem:[#allocation37_spill]]  ;;  %s1816_s19 = smov [#allocation16]  }
  0x21   : > { %s305_s27 = sshll.u32 %s2243_s2, 4  ;;  %p1954_p5 = pnand %p1300_p4, %p64_p1  ;;  %s306_s27 = int_to_ptr.hbm [resolvable:$true] %s305_s27 }
  0x22   : > { %s322_s25 = sshll.u32 %s2246_s4, 4  ;;  %s2225_s2 = smov 8   ;;  %s323_s25 = int_to_ptr.hbm [resolvable:$true] %s322_s25 }
  0x23   : > { %1303 = dma.hbm_to_vmem [thread:$0]  (!%p1954_p5), %s306_s27, 1024, %s308_s30, [#allocation11], %s2223_s26, %s2223_s26, %s2225_s2  }
  0x24   : > { %1306 = dma.hbm_to_vmem [thread:$0]  (!%p1954_p5), %s323_s25, 2048, %s325_s20, [#allocation14], %s2223_s26, %s2223_s26, %s2225_s2  }
  0x25   : > { %s2248_s5 = sld [smem:[#allocation36_spill]]  ;;  %s352_s27 = sshll.u32 %s1816_s19, 4  ;;  %s353_s27 = int_to_ptr.vmem [resolvable:$true] %s352_s27 }
  0x26   : > { %s350_s3 = sshll.u32 %s2247_s6, 4  ;;  %s1817_s7 = smov [#allocation15]   ;;  %s351_s3 = int_to_ptr.hbm [resolvable:$true] %s350_s3 }
  0x27   : > { %1312 = dma.hbm_to_vmem [thread:$0]  (!%p1954_p5), %s351_s3, 2048, %s353_s27, [#allocation17], %s2223_s26, %s2223_s26, %s2225_s2  }
  0x28   : > { %s338_s9 = sshll.u32 %s1817_s7, 4  ;;  %s1818_s19 = smov 256   ;;  %s339_s9 = int_to_ptr.vmem [resolvable:$true] %s338_s9 }
  0x29   : > { %s1819_s20 = smov 16   ;;  %s2249_s8 = sld [smem:[#allocation39_spill]] }
  0x2a   : > { %s1820_s3 = smov [#allocation18]   ;;  %s1186_s12 = sadd.s32 4294967294, %s1810_s23  }
  0x2b   : > { %s336_s4 = sshll.u32 %s2248_s5, 4  ;;  %s369_s10 = sshll.u32 %s1820_s3, 4  ;;  %s337_s4 = int_to_ptr.hbm [resolvable:$true] %s336_s4  ;;  %s370_s10 = int_to_ptr.vmem [resolvable:$true] %s369_s10 }
  0x2c   : > { %1309 = dma.hbm_to_vmem [thread:$0]  (!%p1954_p5), %s337_s4, 4096, %s339_s9, [#allocation14], %s1818_s19, %s1818_s19, %s1819_s20  }
  0x2d   : > { %p57_p6 = scmp.ne.s32.totalorder %s1790_s18, %s1786_s17  ;;  %p58_p7 = scmp.eq.s32.totalorder %s1810_s23, 0 }
  0x2e   : > { %p63_p8 = scmp.ne.s32.totalorder %s1786_s17, %s1782_s16  ;;  %p281_p9 = scmp.eq.s32.totalorder %s1938_s24, 8 }
  0x2f   : > { %s367_s29 = sshll.u32 %s2249_s8, 4  ;;  %p2003_p10 = por %p58_p7, %p57_p6  ;;  %s368_s29 = int_to_ptr.hbm [resolvable:$true] %s367_s29 }
  0x30   : > { %1315 = dma.hbm_to_vmem [thread:$0]  (!%p1954_p5), %s368_s29, 2048, %s370_s10, [#allocation17], %s2223_s26, %s2223_s26, %s2225_s2  }
  0x31   : > { %p287_p11 = scmp.eq.s32.totalorder %s1186_s12, 8  ;;  %p2009_p12 = por %p64_p1, %p63_p8 }
  0x32   : > { %p2013_p13 = por %p281_p9, %p57_p6  ;;  %p1332_p2 = scmp.lt.s32.totalorder %s1810_s23, 9 }
  0x33   : > { %p2017_p0 = por %p287_p11, %p63_p8  ;;  %s386_s20 = sand.u32 1, %s1790_s18  }
  0x34   : > { %s1223_s30 = sshll.u32 %s1806_s22, 4  ;;  %s1194_s25 = sshll.u32 %s386_s20, 4 }
  0x35   : > { %s2253_s19 = scalar_select %p2017_p0, 1, 0 }
  0x36   : > { %s2255_s0 = sld [smem:[#allocation32_spill]]  ;;  %s390_s4 = scalar_lea.vmem [#allocation7], %s1194_s25 }
  0x37   : > { %2254 = sst [smem:[#allocation29_spill]] %s2253_s19  ;;  %s398_s27 = sshll.u32 %s390_s4, 4  ;;  %s399_s27 = int_to_ptr.vmem [resolvable:$true] %s398_s27 }
  0x38   : > { %p1317_p4 = pnand %p1332_p2, %p2003_p10  ;;  %s387_s26 = scalar_lea.sflag [#allocation8], %s386_s20 }
  0x39   : > { %s2256_s5 = smov 128   ;;  %s76_s29 = sadd.s32 1, %s1778_s15 }
  0x3a   : > { %p83_p6 = scmp.ne.s32.totalorder %s1778_s15, %s1774_s14  ;;  %p89_p8 = scmp.ne.s32.totalorder %s1774_s14, %s1770_s13 }
  0x3b   : > { %s408_s4 = sand.u32 1, %s1810_s23   ;;  %s2258_s7 = sadd.s32 1, %s1806_s22 }
  0x3c   : > { %s395_s10 = scalar_lea.hbm %s2255_s0, %s1223_s30  ;;  %s40_s30 = sadd.s32 1, %s1802_s21 }
  0x3d   : > { %s396_s12 = sshll.u32 %s395_s10, 4  ;;  %p41_p5 = scmp.ge.s32.totalorder %s40_s30, 3  ;;  %s397_s12 = int_to_ptr.hbm [resolvable:$true] %s396_s12 }
  0x3e   : > { %1319 = dma.hbm_to_vmem [thread:$0]  (!%p1317_p4), %s397_s12, 256, %s399_s27, %s387_s26, %s2256_s5, %s2256_s5, %s2225_s2  }
  0x3f   : > { %s2287_s30 = smov (%p41_p5, %s40_s30), 0  ;;  %s2289_s7 = smov (!%p41_p5, %s2258_s7), %s1806_s22 }
  0x40   : > { %2257 = sst [smem:[#allocation30_spill]] %s2287_s30  ;;  %s73_s20 = ssub.s32 %s1802_s21, %s2287_s30 }
  0x41   : > { %p2050_p9 = por %p83_p6, %p58_p7  ;;  %p45_p10 = scmp.ge.s32.totalorder %s2289_s7, 3 }
  0x42   : > { %p74_p11 = scmp.eq.s32.totalorder %s73_s20, 0  ;;  %p2056_p4 = por %p89_p8, %p64_p1 }
  0x43   : > { %s2291_s7 = smov (%p45_p10, %s2289_s7), 0  ;;  %s410_s3 = sand.u32 1, %s1778_s15  }
  0x44   : > { %2261 = sst [smem:[#allocation31_spill]] %s2291_s7  ;;  %s47_s25 = ssub.s32 %s1806_s22, %s2291_s7 }
  0x45   : > { %s2063_s27 = scalar_select %p74_p11, %s1778_s15, %s76_s29  }
  0x46   : > { %p48_p7 = scmp.eq.s32.totalorder %s47_s25, 0  ;;  %s1197_s10 = sshll.u32 %s410_s3, 4 }
  0x47   : > { %s1224_s12 = sshll.u32 %s1802_s21, 4  ;;  %s2262_s2 = sadd.s32 1, %s1790_s18 }
  0x48   : > { %s2072_s0 = scalar_select %p48_p7, %s1790_s18, %s2262_s2  }
  0x49   : > { %s417_s8 = scalar_lea.hbm %s2211_s1, %s1224_s12  ;;  %s412_s30 = scalar_lea.vmem [#allocation10], %s1197_s10 }
  0x4a   : > { %s420_s19 = sshll.u32 %s412_s30, 4  ;;  %s418_s16 = sshll.u32 %s417_s8, 4  ;;  %s421_s19 = int_to_ptr.vmem [resolvable:$true] %s420_s19  ;;  %s419_s16 = int_to_ptr.hbm [resolvable:$true] %s418_s16 }
  0x4b   : > { %p1320_p5 = pnand %p1332_p2, %p2050_p9  ;;  %s409_s29 = scalar_lea.sflag [#allocation11], %s408_s4 }
  0x4c   : > { %s2263_s7 = smov 8   ;;  %432 = sbr.rel (%p1946_p3) target bundleno = 1631 (0x65f), region = 60 }
  0x4d   : > { %1322 = dma.hbm_to_vmem [thread:$0]  (!%p1320_p5), %s419_s16, 256, %s421_s19, %s409_s29, %s2256_s5, %s2256_s5, %s2263_s7  }
  0x4e   : > { %s2087_s2 = sand.u32 (!%p1946_p3), 1, %s1786_s17  }
  0x4f   : > { %s1201_s6 = sshll.u32 (!%p1946_p3), %s2087_s2, 4  ;;  %s435_s8 = scalar_lea.sflag (!%p1946_p3), [#allocation8], %s2087_s2 }
  0x50   : > { %s2091_s30 = scalar_lea.vmem (!%p1946_p3), [#allocation7], %s1201_s6 }
  0x51   : > { %1745 = dma.done.wait (%p2009_p12), %s435_s8, 256  }
  0x52   : > { %1747 = vsyncadd (%p2009_p12), %s435_s8, 4294967040  ;;  %s444_s5 = sand.u32 1, %s1938_s24   ;;  %s446_s16 = sand.u32 1, %s1774_s14  }
  0x53   : > { %s2099_s28 = sshll.u32 %s446_s16, 4  ;;  %s445_s19 = scalar_lea.sflag [#allocation11], %s444_s5 }
  0x54   : > { %s448_s4 = scalar_lea.vmem [#allocation10], %s2099_s28 }
  0x55   : > { %1749 = dma.done.wait (%p2056_p4), %s445_s19, 256  }
  0x56   : > { %1751 = vsyncadd (%p2056_p4), %s445_s19, 4294967040 }
  0x57   : > { %1753 = dma.done.wait (%p64_p1), [#allocation11], 1024  }
  0x58   : > { %1755 = vsyncadd (%p64_p1), [#allocation11], 4294966272 }
  0x59   : > { %1757 = dma.done.wait (%p64_p1), [#allocation14], 6144  }
  0x5a   : > { %1759 = vsyncadd (%p64_p1), [#allocation14], 4294961152 }
  0x5b   : > { %1761 = dma.done.wait (%p64_p1), [#allocation17], 4096  }
  0x5c   : > { %1763 = vsyncadd (%p64_p1), [#allocation17], 4294963200  ;;  %s2118_s11 = scalar_lea.vmem [#allocation19], %s1201_s6  ;;  %s2264_s7 = sld [smem:[#allocation27_spill]] }
  0x62   : > { %p1209_p3 = scmp.ne.s32.totalorder %s2264_s7, 0 }
  0x63   : > { %s2265_s13 = sld [smem:[#allocation34_spill]] (!%p1209_p3) }
  0x64   : > { %522 = sbr.rel (%p1209_p3) target bundleno = 390 (0x186), region = 92 }
  0x69   : > { %v532_v0 = vld [vmem:[#allocation12 + $0x38] sm:$0xff]  ;;  %v531_v1 = vld [vmem:[#allocation12 + $0x30] sm:$0xff]  ;;  %v530_v2 = vld [vmem:[#allocation12 + $0x28] sm:$0xff]  ;;  %vm537_vm0 = vcmask 523264   ;;  %vm610_vm1 = vcmask 7168   ;;  %v1822_v32 = vmov 0.0  }
  0x6a   : > { %552 = vmatpush.msra.mxu0 %v532_v0  ;;  %v584_v3 = vld [vmem:[#allocation13 + $0x78] sm:$0xff]  ;;  %v583_v4 = vld [vmem:[#allocation13 + $0x70] sm:$0xff]  ;;  %v529_v5 = vld [vmem:[#allocation12 + $0x20] sm:$0xff]  ;;  %v1821_v31 = vmov -1e+30   ;;  %613 = vst.msk [vmem:[#allocation5] sm:$0xff] %vm610_vm1, %v1822_v32 }
  0x6b   : > { %585 = vmatpush.msra.mxu1 %v584_v3  ;;  %1226 = vmatpush.msra.mxu2 %v584_v3  ;;  %v582_v6 = vld [vmem:[#allocation13 + $0x68] sm:$0xff]  ;;  %v528_v7 = vld [vmem:[#allocation12 + $0x18] sm:$0xff]  ;;  %v581_v8 = vld [vmem:[#allocation13 + $0x60] sm:$0xff]  ;;  %611 = vst.msk [vmem:[#allocation4] sm:$0xff] %vm610_vm1, %v1821_v31 }
  0x6c   : > { %553 = vmatpush.msra.mxu0 %v531_v1  ;;  %v527_v9 = vld [vmem:[#allocation12 + $0x10] sm:$0xff]  ;;  %v580_v10 = vld [vmem:[#allocation13 + $0x58] sm:$0xff]  ;;  %v526_v11 = vld [vmem:[#allocation12 + $0x8] sm:$0xff]  ;;  %612 = vst.msk [vmem:[#allocation4 + $0x8] sm:$0xff] %vm610_vm1, %v1821_v31 }
  0x6d   : > { %586 = vmatpush.msra.mxu1 %v583_v4  ;;  %1227 = vmatpush.msra.mxu2 %v583_v4  ;;  %v579_v12 = vld [vmem:[#allocation13 + $0x50] sm:$0xff]  ;;  %v525_v13 = vld [vmem:[#allocation12] sm:$0xff]  ;;  %v578_v15 = vld [vmem:[#allocation13 + $0x48] sm:$0xff]  ;;  %614 = vst.msk [vmem:[#allocation5 + $0x8] sm:$0xff] %vm610_vm1, %v1822_v32 }
  0x6e   : > { %554 = vmatpush.msra.mxu0 %v530_v2  ;;  %v523_v14 = vld [vmem:[%s2091_s30] sm:$0xff]  ;;  %v576_v17 = vld [vmem:[#allocation13 + $0x38] sm:$0xff]  ;;  %v574_v20 = vld [vmem:[#allocation13 + $0x28] sm:$0xff]  ;;  %615 = vst [vmem:[#allocation6 + $0x8] sm:$0xff] %v1822_v32 }
  0x6f   : > { %587 = vmatpush.msra.mxu1 %v582_v6  ;;  %1228 = vmatpush.msra.mxu2 %v582_v6  ;;  %v577_v16 = vld [vmem:[#allocation13 + $0x40] sm:$0xff]  ;;  %v575_v18 = vld [vmem:[#allocation13 + $0x30] sm:$0xff]  ;;  %v524_v19 = vld [vmem:[%s2091_s30 + $0x8] sm:$0xff]  ;;  %616 = vst [vmem:[#allocation6] sm:$0xff] %v1822_v32 }
  0x70   : > { %555 = vmatpush.msra.mxu0 %v529_v5  ;;  %v573_v21 = vld [vmem:[#allocation13 + $0x20] sm:$0xff]  ;;  %v572_v22 = vld [vmem:[#allocation13 + $0x18] sm:$0xff]  ;;  %v571_v23 = vld [vmem:[#allocation13 + $0x10] sm:$0xff] }
  0x71   : > { %588 = vmatpush.msra.mxu1 %v581_v8  ;;  %1229 = vmatpush.msra.mxu2 %v581_v8  ;;  %v570_v24 = vld [vmem:[#allocation13 + $0x8] sm:$0xff]  ;;  %v569_v25 = vld [vmem:[#allocation13] sm:$0xff]  ;;  %v1442_v26 = vld [vmem:[%s2265_s13] ss:$0 sm:$0xff] }
  0x72   : > { %556 = vmatpush.msra.mxu0 %v528_v7 }
  0x73   : > { %589 = vmatpush.msra.mxu1 %v580_v10  ;;  %1230 = vmatpush.msra.mxu2 %v580_v10 }
  0x74   : > { %557 = vmatpush.msra.mxu0 %v527_v9 }
  0x75   : > { %590 = vmatpush.msra.mxu1 %v579_v12  ;;  %1231 = vmatpush.msra.mxu2 %v579_v12 }
  0x76   : > { %558 = vmatpush.msra.mxu0 %v526_v11 }
  0x77   : > { %591 = vmatpush.msra.mxu1 %v578_v15  ;;  %1232 = vmatpush.msra.mxu2 %v578_v15 }
  0x78   : > { %559 = vmatpush.msra.mxu0 %v525_v13 }
  0x79   : > { %1210 = vmatmul.msk.f32.vlgmr.msra.gmra.mxu0 %vm537_vm0, %v523_v14  ;;  %592 = vmatpush.msra.mxu1 %v577_v16 }
  0x7a   : > { %1233 = vmatpush.msra.mxu2 %v577_v16 }
  0x7b   : > { %593 = vmatpush.msra.mxu1 %v576_v17 }
  0x7c   : > { %1234 = vmatpush.msra.mxu2 %v576_v17 }
  0x7d   : > { %594 = vmatpush.msra.mxu1 %v575_v18 }
  0x7e   : > { %1235 = vmatpush.msra.mxu2 %v575_v18 }
  0x7f   : > { %595 = vmatpush.msra.mxu1 %v574_v20 }
  0x80   : > { %1236 = vmatpush.msra.mxu2 %v574_v20 }
  0x81   : > { %1211 = vmatmul.msk.f32.gmra.mxu0 %vm537_vm0, %v524_v19  ;;  %596 = vmatpush.msra.mxu1 %v573_v21 }
  0x82   : > { %1237 = vmatpush.msra.mxu2 %v573_v21 }
  0x83   : > { %597 = vmatpush.msra.mxu1 %v572_v22 }
  0x84   : > { %1238 = vmatpush.msra.mxu2 %v572_v22 }
  0x85   : > { %598 = vmatpush.msra.mxu1 %v571_v23 }
  0x86   : > { %1239 = vmatpush.msra.mxu2 %v571_v23 }
  0x87   : > { %599 = vmatpush.msra.mxu1 %v570_v24 }
  0x88   : > { %1240 = vmatpush.msra.mxu2 %v570_v24 }
  0x89   : > { %600 = vmatpush.msra.mxu1 %v569_v25 }
  0x8a   : > { %1241 = vmatpush.msra.mxu2 %v569_v25 }
  0xf6   : > { %v561_v27 = vpop.f32.mrf.mxu0 }
  0xf7   : > { %v562_v28 = vadd.f32 %v1442_v26, %v561_v27 }
  0xf9   : > { %567 = vst [vmem:[#allocation2] sm:$0xff] %v562_v28  ;;  %601 = vmatmul.f32.vlgmr.msra.gmra.mxu1 %v562_v28 }
  0xfe   : > { %v564_v29 = vpop.f32.mrf.mxu0 }
  0xff   : > { %v565_v30 = vadd.f32 %v1442_v26, %v564_v29 }
 0x101   : > { %568 = vst [vmem:[#allocation2 + $0x8] sm:$0xff] %v565_v30  ;;  %604 = vmatmul.f32.vlgmr.msra.gmra.mxu2 %v565_v30 }
 0x176   : > { %v602_v33 = vpop.f32.mrf.mxu1 }
 0x177   : > { %608 = vst [vmem:[#allocation3 + $0x8] sm:$0xff] %v602_v33 }
 0x184   : > { %v605_v34 = vpop.f32.mrf.mxu2 }
 0x185   : > { %609 = vst [vmem:[#allocation3] sm:$0xff] %v605_v34 }
 0x186 PF: > { %v626_v35 = vld [vmem:[#allocation12 + $0x38] sm:$0xff]  ;;  %v625_v36 = vld [vmem:[#allocation12 + $0x30] sm:$0xff]  ;;  %v624_v37 = vld [vmem:[#allocation12 + $0x28] sm:$0xff]  ;;  %vm631_vm2 = vcmask 523264   ;;  %s2266_s10 = sld [smem:[#allocation34_spill]]  ;;  %v767_v24 = vlaneseq  ;;  %vm776_vm4 = vcmask 130048  }
 0x187   : > { %646 = vmatpush.msra.mxu0 %v626_v35  ;;  %v691_v38 = vld [vmem:[#allocation15 + $0xf0] sm:$0xff]  ;;  %v692_v39 = vld [vmem:[#allocation15 + $0xf8] sm:$0xff]  ;;  %v623_v40 = vld [vmem:[#allocation12 + $0x20] sm:$0xff]  ;;  %s2267_s12 = sld [smem:[#allocation27_spill]]  ;;  %vm819_vm5 = vcmask 7168  }
 0x188   : > { %693 = vmatpush.msra.mxu1 %v691_v38  ;;  %716 = vmatpush.msra.mxu2 %v692_v39  ;;  %v689_v41 = vld [vmem:[#allocation15 + $0xe0] sm:$0xff]  ;;  %v690_v42 = vld [vmem:[#allocation15 + $0xe8] sm:$0xff]  ;;  %v687_v43 = vld [vmem:[#allocation15 + $0xd0] sm:$0xff]  ;;  %v768_v25 = vand.u32 127, %v767_v24 }
 0x189   : > { %647 = vmatpush.msra.mxu0 %v625_v36  ;;  %v688_v44 = vld [vmem:[#allocation15 + $0xd8] sm:$0xff]  ;;  %v685_v46 = vld [vmem:[#allocation15 + $0xc0] sm:$0xff]  ;;  %v686_v47 = vld [vmem:[#allocation15 + $0xc8] sm:$0xff]  ;;  %v1823_v36 = vmov 0  }
 0x18a   : > { %v622_v45 = vld [vmem:[#allocation12 + $0x18] sm:$0xff]  ;;  %694 = vmatpush.msra.mxu1 %v689_v41  ;;  %717 = vmatpush.msra.mxu2 %v690_v42  ;;  %v621_v48 = vld [vmem:[#allocation12 + $0x10] sm:$0xff]  ;;  %v620_v51 = vld [vmem:[#allocation12 + $0x8] sm:$0xff] }
 0x18b   : > { %648 = vmatpush.msra.mxu0 %v624_v37  ;;  %v683_v49 = vld [vmem:[#allocation15 + $0xb0] sm:$0xff]  ;;  %v684_v50 = vld [vmem:[#allocation15 + $0xb8] sm:$0xff]  ;;  %v681_v52 = vld [vmem:[#allocation15 + $0xa0] sm:$0xff]  ;;  %1443 = vset.pattern.permute.xlu1 %v1823_v36 }
 0x18c   : > { %695 = vmatpush.msra.mxu1 %v687_v43  ;;  %718 = vmatpush.msra.mxu2 %v688_v44  ;;  %v682_v53 = vld [vmem:[#allocation15 + $0xa8] sm:$0xff]  ;;  %v619_v54 = vld [vmem:[#allocation12] sm:$0xff]  ;;  %v679_v56 = vld [vmem:[#allocation15 + $0x90] sm:$0xff] }
 0x18d   : > { %649 = vmatpush.msra.mxu0 %v623_v40  ;;  %v617_v55 = vld [vmem:[%s448_s4] sm:$0xff]  ;;  %v680_v57 = vld [vmem:[#allocation15 + $0x98] sm:$0xff]  ;;  %v678_v59 = vld [vmem:[#allocation15 + $0x88] sm:$0xff]  ;;  %s1214_s20 = sshll.u32 %s2267_s12, 4  ;;  %1444 = vset.pattern.permute.xlu2 %v1823_v36  ;;  %p1217_p1 = scmp.ne.s32.totalorder %s2267_s12, 2 }
 0x18e   : > { %696 = vmatpush.msra.mxu1 %v685_v46  ;;  %719 = vmatpush.msra.mxu2 %v686_v47  ;;  %v677_v58 = vld [vmem:[#allocation15 + $0x80] sm:$0xff]  ;;  %v675_v60 = vld [vmem:[#allocation15 + $0x70] sm:$0xff]  ;;  %v676_v61 = vld [vmem:[#allocation15 + $0x78] sm:$0xff]  ;;  %v769_v26 = vstv %s1214_s20  ;;  %s2268_s8 = sld [smem:[#allocation38_spill]] (!%p1217_p1) }
 0x18f   : > { %650 = vmatpush.msra.mxu0 %v622_v45  ;;  %v673_v62 = vld [vmem:[#allocation15 + $0x60] sm:$0xff]  ;;  %v674_v63 = vld [vmem:[#allocation15 + $0x68] sm:$0xff]  ;;  %v671_v1 = vld [vmem:[#allocation15 + $0x50] sm:$0xff]  ;;  %v770_v27 = vadd.s32 %v769_v26, %v768_v25  ;;  %1445 = vset.pattern.permute.xlu0 %v1823_v36  ;;  %s2269_s16 = sld [smem:[#allocation40_spill]] (!%p1217_p1) }
 0x190   : > { %697 = vmatpush.msra.mxu1 %v683_v49  ;;  %720 = vmatpush.msra.mxu2 %v684_v50  ;;  %v618_v0 = vld [vmem:[%s448_s4 + $0x8] sm:$0xff]  ;;  %v669_v3 = vld [vmem:[#allocation15 + $0x40] sm:$0xff]  ;;  %v667_v5 = vld [vmem:[#allocation15 + $0x30] sm:$0xff] }
 0x191   : > { %651 = vmatpush.msra.mxu0 %v621_v48  ;;  %v672_v2 = vld [vmem:[#allocation15 + $0x58] sm:$0xff]  ;;  %v670_v4 = vld [vmem:[#allocation15 + $0x48] sm:$0xff]  ;;  %v665_v7 = vld [vmem:[#allocation15 + $0x20] sm:$0xff]  ;;  %vm771_vm3 = vcmp.lt.s32.totalorder %v770_v27, 40 }
 0x192   : > { %698 = vmatpush.msra.mxu1 %v681_v52  ;;  %721 = vmatpush.msra.mxu2 %v682_v53  ;;  %v668_v6 = vld [vmem:[#allocation15 + $0x38] sm:$0xff]  ;;  %v666_v8 = vld [vmem:[#allocation15 + $0x28] sm:$0xff]  ;;  %v663_v9 = vld [vmem:[#allocation15 + $0x10] sm:$0xff] }
 0x193   : > { %652 = vmatpush.msra.mxu0 %v620_v51  ;;  %v664_v10 = vld [vmem:[#allocation15 + $0x18] sm:$0xff]  ;;  %v661_v11 = vld [vmem:[#allocation15] sm:$0xff]  ;;  %v662_v12 = vld [vmem:[#allocation15 + $0x8] sm:$0xff] }
 0x194   : > { %699 = vmatpush.msra.mxu1 %v679_v56  ;;  %722 = vmatpush.msra.mxu2 %v680_v57  ;;  %v1446_v13 = vld [vmem:[%s2266_s10] ss:$0 sm:$0xff]  ;;  %v739_v21 = vld [vmem:[#allocation3 + $0x8] sm:$0xff]  ;;  %v740_v23 = vld [vmem:[#allocation3] sm:$0xff] }
 0x195   : > { %653 = vmatpush.msra.mxu0 %v619_v54  ;;  %v774_v37 = vld [vmem:[#allocation4] sm:$0xff]  ;;  %v775_v42 = vld [vmem:[#allocation4 + $0x8] sm:$0xff] }
 0x196   : > { %1212 = vmatmul.msk.f32.vlgmr.msra.gmra.mxu0 %vm631_vm2, %v617_v55  ;;  %700 = vmatpush.msra.mxu1 %v677_v58 }
 0x197   : > { %723 = vmatpush.msra.mxu2 %v678_v59  ;;  %v807_v59 = vld [vmem:[#allocation5] sm:$0xff] }
 0x198   : > { %701 = vmatpush.msra.mxu1 %v675_v60 }
 0x199   : > { %724 = vmatpush.msra.mxu2 %v676_v61 }
 0x19a   : > { %702 = vmatpush.msra.mxu1 %v673_v62 }
 0x19b   : > { %725 = vmatpush.msra.mxu2 %v674_v63  ;;  %v808_v63 = vld [vmem:[#allocation5 + $0x8] sm:$0xff] }
 0x19c   : > { %703 = vmatpush.msra.mxu1 %v671_v1 }
 0x19d   : > { %726 = vmatpush.msra.mxu2 %v672_v2 }
 0x19e   : > { %1213 = vmatmul.msk.f32.gmra.mxu0 %vm631_vm2, %v618_v0  ;;  %704 = vmatpush.msra.mxu1 %v669_v3 }
 0x19f   : > { %727 = vmatpush.msra.mxu2 %v670_v4  ;;  %v822_v4 = vld [vmem:[#allocation6 + $0x8] sm:$0xff] }
 0x1a0   : > { %705 = vmatpush.msra.mxu1 %v667_v5 }
 0x1a1   : > { %728 = vmatpush.msra.mxu2 %v668_v6 }
 0x1a2   : > { %706 = vmatpush.msra.mxu1 %v665_v7 }
 0x1a3   : > { %729 = vmatpush.msra.mxu2 %v666_v8  ;;  %v823_v8 = vld [vmem:[#allocation6] sm:$0xff] }
 0x1a4   : > { %707 = vmatpush.msra.mxu1 %v663_v9 }
 0x1a5   : > { %730 = vmatpush.msra.mxu2 %v664_v10 }
 0x1a6   : > { %708 = vmatpush.msra.mxu1 %v661_v11 }
 0x1a7   : > { %731 = vmatpush.msra.mxu2 %v662_v12 }
 0x213   : > { %v655_v14 = vpop.f32.mrf.mxu0 }
 0x214   : > { %v656_v15 = vadd.f32 %v1446_v13, %v655_v14 }
 0x216   : > { %709 = vmatmul.f32.vlgmr.msra.gmra.mxu1 %v656_v15  ;;  %732 = vmatmul.f32.vlgmr.msra.gmra.mxu2 %v656_v15 }
 0x21b   : > { %v658_v16 = vpop.f32.mrf.mxu0 }
 0x21c   : > { %v659_v17 = vadd.f32 %v1446_v13, %v658_v16 }
 0x21e   : > { %712 = vmatmul.f32.gmra.mxu1 %v659_v17  ;;  %735 = vmatmul.f32.gmra.mxu2 %v659_v17 }
 0x293   : > { %v710_v18 = vpop.f32.mrf.mxu1 }
 0x299   : > { %v733_v19 = vpop.f32.mrf.mxu2 }
 0x29b   : > { %v713_v20 = vpop.f32.mrf.mxu1 }
 0x29c   : > { %755 = vmatpush.xpose.msra.mxu3 %v713_v20 }
 0x2a0   : > { %756 = vmatpush.xpose.msra.mxu3 %v710_v18 }
 0x2a1   : > { %v736_v22 = vpop.f32.mrf.mxu2 }
 0x2a3   : > { %757 = vmatmul.f32.vlgmr.msra.gmra.mxu3 %v739_v21 }
 0x2a4   : > { %856 = vmatpush.msrb.mxu3 %v736_v22 }
 0x2a6   : > { %857 = vmatpush.msrb.mxu3 %v733_v19 }
 0x2ab   : > { %760 = vmatmul.f32.gmra.mxu3 %v740_v23 }
 0x326   : > { %v758_v28 = vpop.f32.mrf.mxu3 }
 0x327   : > { %v764_v29 = vmul.f32 0.088388346, %v758_v28 }
 0x329   : > { %v772_v30 = vsel %vm771_vm3, %v764_v29, -1e+30 }
 0x32a   : > { %v777_v31 = vsel %vm776_vm4, %v772_v30, -inf }
 0x32b   : > { %778 = vmax.xlane.f32.xlu0 %v777_v31 }
 0x32e   : > { %v761_v32 = vpop.f32.mrf.mxu3 }
 0x32f   : > { %v765_v33 = vmul.f32 0.088388346, %v761_v32 }
 0x331   : > { %v773_v34 = vsel %vm771_vm3, %v765_v33, -1e+30 }
 0x332   : > { %v780_v35 = vsel %vm776_vm4, %v773_v34, -inf }
 0x333   : > { %781 = vmax.xlane.f32.xlu0 %v780_v35 }
 0x39e   : > { %v779_v38 = vpop.xlane.xlu0 %778 }
 0x39f   : > { %v783_v39 = vmax.f32 %v774_v37, %v779_v38 }
 0x3a1   : > { %v785_v40 = vsub.f32 %v774_v37, %v783_v39  ;;  %869 = vst.msk [vmem:[#allocation4] sm:$0xff] %vm819_vm5, %v783_v39  ;;  %793 = vperm.xlu1 %1443, %v783_v39  }
 0x3a3   : > { %v787_v41 = vmul.f32 1.442695, %v785_v40 }
 0x3a5   : > { %1447 = vpow2.f32 %v787_v41 }
 0x3a6   : > { %v782_v43 = vpop.xlane.xlu0 %781 }
 0x3a7   : > { %v784_v44 = vmax.f32 %v775_v42, %v782_v43 }
 0x3a9   : > { %v786_v45 = vsub.f32 %v775_v42, %v784_v44  ;;  %870 = vst.msk [vmem:[#allocation4 + $0x8] sm:$0xff] %vm819_vm5, %v784_v44  ;;  %798 = vperm.xlu1 %1443, %v784_v44  }
 0x3ab   : > { %v1448_v46 = vpop.eup %1447  ;;  %v789_v47 = vmul.f32 1.442695, %v786_v45 }
 0x3ac   : > { %826 = vperm.xlu2 %1444, %v1448_v46   ;;  %v809_v60 = vmul.f32 %v1448_v46, %v807_v59 }
 0x3ad   : > { %1449 = vpow2.f32 %v789_v47 }
 0x3b3   : > { %v1450_v48 = vpop.eup %1449 }
 0x3b4   : > { %831 = vperm.xlu2 %1444, %v1450_v48   ;;  %v810_v0 = vmul.f32 %v1450_v48, %v808_v63 }
 0x406   : > { %v827_v2 = vpop.permute.xlu2 %826 }
 0x407   : > { %v834_v5 = vmul.f32 %v827_v2, %v822_v4 }
 0x40e   : > { %v832_v9 = vpop.permute.xlu2 %831 }
 0x40f   : > { %v835_v10 = vmul.f32 %v832_v9, %v823_v8 }
 0x413   : > { %v794_v49 = vpop.permute.xlu1 %793 }
 0x414   : > { %v801_v50 = vsub.f32 %v772_v30, %v794_v49 }
 0x416   : > { %v803_v51 = vmul.f32 1.442695, %v801_v50 }
 0x418   : > { %1451 = vpow2.f32 %v803_v51 }
 0x41b   : > { %v799_v52 = vpop.permute.xlu1 %798 }
 0x41c   : > { %v802_v53 = vsub.f32 %v773_v34, %v799_v52 }
 0x41e   : > { %v1452_v54 = vpop.eup %1451  ;;  %v805_v55 = vmul.f32 1.442695, %v802_v53 }
 0x41f   : > { %1215 = vmatmul.msk.f32.vlgmr.msrb.gmra.mxu3 %vm776_vm4, %v1452_v54  ;;  %v811_v56 = vsel %vm776_vm4, %v1452_v54, 0.0 }
 0x420   : > { %1453 = vpow2.f32 %v805_v55  ;;  %812 = vadd.xlane.f32.xlu0 %v811_v56 }
 0x426   : > { %v1454_v57 = vpop.eup %1453 }
 0x427   : > { %1216 = vmatmul.msk.f32.gmra.mxu3 %vm776_vm4, %v1454_v57  ;;  %v814_v58 = vsel %vm776_vm4, %v1454_v57, 0.0 }
 0x428   : > { %815 = vadd.xlane.f32.xlu1 %v814_v58 }
 0x493   : > { %v813_v61 = vpop.xlane.xlu0 %812 }
 0x494   : > { %v817_v62 = vadd.f32 %v813_v61, %v809_v60 }
 0x496   : > { %820 = vst.msk [vmem:[#allocation5] sm:$0xff] %vm819_vm5, %v817_v62 }
 0x49b   : > { %v816_v1 = vpop.xlane.xlu1 %815 }
 0x49c   : > { %v818_v3 = vadd.f32 %v816_v1, %v810_v0 }
 0x49e   : > { %821 = vst.msk [vmem:[#allocation5 + $0x8] sm:$0xff] %vm819_vm5, %v818_v3 }
 0x4a2   : > { %v859_v6 = vpop.f32.mrf.mxu3 }
 0x4a3   : > { %v865_v7 = vadd.f32 %v859_v6, %v834_v5 }
 0x4a5   : > { %867 = vst [vmem:[#allocation6 + $0x8] sm:$0xff] %v865_v7 }
 0x4a9   : > { %874 = sbr.rel (%p1217_p1) target bundleno = 1609 (0x649), region = 96 }
 0x4aa   : > { %v862_v11 = vpop.f32.mrf.mxu3 }
 0x4ab   : > { %v866_v12 = vadd.f32 %v862_v11, %v835_v10 }
 0x4ad   : > { %868 = vst [vmem:[#allocation6] sm:$0xff] %v866_v12 }
 0x4ae   : > { %v880_v13 = vld [vmem:[#allocation5 + $0x8] sm:$0xff]  ;;  %v938_v14 = vld [vmem:[#allocation16 + $0x78] sm:$0xff]  ;;  %v1824_v15 = vmov 0   ;;  %v937_v16 = vld [vmem:[#allocation16 + $0x70] sm:$0xff] }
 0x4af   : > { %1455 = vset.pattern.permute.xlu0 %v1824_v15  ;;  %1242 = vmatpush.msra.mxu2 %v938_v14  ;;  %v936_v17 = vld [vmem:[#allocation16 + $0x68] sm:$0xff]  ;;  %v935_v18 = vld [vmem:[#allocation16 + $0x60] sm:$0xff]  ;;  %v934_v19 = vld [vmem:[#allocation16 + $0x58] sm:$0xff] }
 0x4b0   : > { %888 = vperm.xlu0 %1455, %v880_v13   ;;  %943 = vmatpush.msra.mxu0 %v938_v14  ;;  %v879_v20 = vld [vmem:[#allocation5] sm:$0xff]  ;;  %v933_v21 = vld [vmem:[#allocation16 + $0x50] sm:$0xff]  ;;  %v932_v22 = vld [vmem:[#allocation16 + $0x48] sm:$0xff] }
 0x4b1   : > { %1243 = vmatpush.msra.mxu2 %v937_v16  ;;  %v931_v23 = vld [vmem:[#allocation16 + $0x40] sm:$0xff]  ;;  %v930_v24 = vld [vmem:[#allocation16 + $0x38] sm:$0xff]  ;;  %v929_v25 = vld [vmem:[#allocation16 + $0x30] sm:$0xff] }
 0x4b2   : > { %944 = vmatpush.msra.mxu0 %v937_v16  ;;  %v928_v26 = vld [vmem:[#allocation16 + $0x28] sm:$0xff]  ;;  %v927_v27 = vld [vmem:[#allocation16 + $0x20] sm:$0xff]  ;;  %v926_v28 = vld [vmem:[#allocation16 + $0x18] sm:$0xff] }
 0x4b3   : > { %1244 = vmatpush.msra.mxu2 %v936_v17  ;;  %v925_v29 = vld [vmem:[#allocation16 + $0x10] sm:$0xff]  ;;  %v924_v30 = vld [vmem:[#allocation16 + $0x8] sm:$0xff]  ;;  %v923_v31 = vld [vmem:[#allocation16] sm:$0xff] }
 0x4b4   : > { %945 = vmatpush.msra.mxu0 %v936_v17  ;;  %v983_v32 = vld [vmem:[#allocation18 + $0x78] sm:$0xff]  ;;  %v982_v33 = vld [vmem:[#allocation18 + $0x70] sm:$0xff]  ;;  %v981_v35 = vld [vmem:[#allocation18 + $0x68] sm:$0xff] }
 0x4b5   : > { %1245 = vmatpush.msra.mxu2 %v935_v18  ;;  %1258 = vmatpush.msra.mxu3 %v983_v32  ;;  %v980_v36 = vld [vmem:[#allocation18 + $0x60] sm:$0xff]  ;;  %v979_v37 = vld [vmem:[#allocation18 + $0x58] sm:$0xff]  ;;  %v978_v38 = vld [vmem:[#allocation18 + $0x50] sm:$0xff] }
 0x4b6   : > { %946 = vmatpush.msra.mxu0 %v935_v18  ;;  %988 = vmatpush.msra.mxu1 %v983_v32  ;;  %v977_v42 = vld [vmem:[#allocation18 + $0x48] sm:$0xff]  ;;  %v976_v44 = vld [vmem:[#allocation18 + $0x40] sm:$0xff]  ;;  %v975_v48 = vld [vmem:[#allocation18 + $0x38] sm:$0xff] }
 0x4b7   : > { %1246 = vmatpush.msra.mxu2 %v934_v19  ;;  %1259 = vmatpush.msra.mxu3 %v982_v33  ;;  %v974_v50 = vld [vmem:[#allocation18 + $0x30] sm:$0xff]  ;;  %v973_v56 = vld [vmem:[#allocation18 + $0x28] sm:$0xff]  ;;  %v876_v57 = vld [vmem:[#allocation2 + $0x8] sm:$0xff] }
 0x4b8   : > { %883 = vperm.xlu0 %1455, %v879_v20   ;;  %947 = vmatpush.msra.mxu0 %v934_v19  ;;  %v878_v52 = vld [vmem:[#allocation6] sm:$0xff]  ;;  %v972_v61 = vld [vmem:[#allocation18 + $0x20] sm:$0xff]  ;;  %v971_v2 = vld [vmem:[#allocation18 + $0x18] sm:$0xff] }
 0x4b9   : > { %1247 = vmatpush.msra.mxu2 %v933_v21  ;;  %989 = vmatpush.msra.mxu1 %v982_v33  ;;  %v877_v5 = vld [vmem:[#allocation6 + $0x8] sm:$0xff]  ;;  %v875_v7 = vld [vmem:[#allocation2] sm:$0xff]  ;;  %v969_v12 = vld [vmem:[#allocation18 + $0x8] sm:$0xff] }
 0x4ba   : > { %948 = vmatpush.msra.mxu0 %v933_v21  ;;  %1260 = vmatpush.msra.mxu3 %v981_v35  ;;  %v970_v11 = vld [vmem:[#allocation18 + $0x10] sm:$0xff]  ;;  %v968_v13 = vld [vmem:[#allocation18] sm:$0xff] }
 0x4bb   : > { %1248 = vmatpush.msra.mxu2 %v932_v22  ;;  %990 = vmatpush.msra.mxu1 %v981_v35  ;;  %v1456_v14 = vld [vmem:[%s2268_s8] ss:$0 sm:$0xff] }
 0x4bc   : > { %949 = vmatpush.msra.mxu0 %v932_v22  ;;  %1261 = vmatpush.msra.mxu3 %v980_v36  ;;  %v1457_v21 = vld [vmem:[%s2269_s16] ss:$0 sm:$0xff] }
 0x4bd   : > { %1249 = vmatpush.msra.mxu2 %v931_v23  ;;  %991 = vmatpush.msra.mxu1 %v980_v36 }
 0x4be   : > { %950 = vmatpush.msra.mxu0 %v931_v23  ;;  %1262 = vmatpush.msra.mxu3 %v979_v37 }
 0x4bf   : > { %1250 = vmatpush.msra.mxu2 %v930_v24  ;;  %992 = vmatpush.msra.mxu1 %v979_v37 }
 0x4c0   : > { %951 = vmatpush.msra.mxu0 %v930_v24  ;;  %1263 = vmatpush.msra.mxu3 %v978_v38 }
 0x4c1   : > { %1251 = vmatpush.msra.mxu2 %v929_v25  ;;  %993 = vmatpush.msra.mxu1 %v978_v38 }
 0x4c2   : > { %952 = vmatpush.msra.mxu0 %v929_v25  ;;  %1264 = vmatpush.msra.mxu3 %v977_v42 }
 0x4c3   : > { %1252 = vmatpush.msra.mxu2 %v928_v26  ;;  %994 = vmatpush.msra.mxu1 %v977_v42 }
 0x4c4   : > { %953 = vmatpush.msra.mxu0 %v928_v26  ;;  %1265 = vmatpush.msra.mxu3 %v976_v44 }
 0x4c5   : > { %1253 = vmatpush.msra.mxu2 %v927_v27  ;;  %995 = vmatpush.msra.mxu1 %v976_v44 }
 0x4c6   : > { %954 = vmatpush.msra.mxu0 %v927_v27  ;;  %1266 = vmatpush.msra.mxu3 %v975_v48 }
 0x4c7   : > { %1254 = vmatpush.msra.mxu2 %v926_v28  ;;  %996 = vmatpush.msra.mxu1 %v975_v48 }
 0x4c8   : > { %955 = vmatpush.msra.mxu0 %v926_v28  ;;  %1267 = vmatpush.msra.mxu3 %v974_v50 }
 0x4c9   : > { %1255 = vmatpush.msra.mxu2 %v925_v29  ;;  %997 = vmatpush.msra.mxu1 %v974_v50 }
 0x4ca   : > { %956 = vmatpush.msra.mxu0 %v925_v29  ;;  %1268 = vmatpush.msra.mxu3 %v973_v56 }
 0x4cb   : > { %1256 = vmatpush.msra.mxu2 %v924_v30  ;;  %998 = vmatpush.msra.mxu1 %v973_v56 }
 0x4cc   : > { %957 = vmatpush.msra.mxu0 %v924_v30  ;;  %1269 = vmatpush.msra.mxu3 %v972_v61 }
 0x4cd   : > { %1257 = vmatpush.msra.mxu2 %v923_v31  ;;  %999 = vmatpush.msra.mxu1 %v972_v61 }
 0x4ce   : > { %958 = vmatpush.msra.mxu0 %v923_v31  ;;  %1270 = vmatpush.msra.mxu3 %v971_v2 }
 0x4cf   : > { %1000 = vmatpush.msra.mxu1 %v971_v2 }
 0x4d0   : > { %1271 = vmatpush.msra.mxu3 %v970_v11 }
 0x4d1   : > { %1001 = vmatpush.msra.mxu1 %v970_v11 }
 0x4d2   : > { %1272 = vmatpush.msra.mxu3 %v969_v12 }
 0x4d3   : > { %1002 = vmatpush.msra.mxu1 %v969_v12 }
 0x4d4   : > { %1273 = vmatpush.msra.mxu3 %v968_v13 }
 0x4d5   : > { %1003 = vmatpush.msra.mxu1 %v968_v13 }
 0x522   : > { %v889_v34 = vpop.permute.xlu0 %888 }
 0x523   : > { %1458 = vrcp.f32 %v889_v34  ;;  %v917_v45 = vand.u32 2147483648, %v889_v34  ;;  %v915_v47 = vand.u32 2147483647, %v889_v34  ;;  %vm911_vm7 = vweird.f32 %v889_v34 }
 0x525   : > { %v918_v53 = vor.u32 1.1754944e-38, %v917_v45  ;;  %vm916_vm9 = vcmp.eq.f32.partialorder %v915_v47, 8.507059e+37 }
 0x529   : > { %v1459_v39 = vpop.eup %1458 }
 0x52a   : > { %v907_v40 = vmul.f32 %v1459_v39, %v889_v34  ;;  %v884_v41 = vpop.permute.xlu0 %883  ;;  %vm912_vm6 = vweird.f32 %v1459_v39 }
 0x52b   : > { %1460 = vrcp.f32 %v884_v41  ;;  %vm913_vm8 = vmor %vm911_vm7, %vm912_vm6  ;;  %v902_v62 = vand.u32 2147483648, %v884_v41  ;;  %v900_v0 = vand.u32 2147483647, %v884_v41  ;;  %vm896_vm11 = vweird.f32 %v884_v41 }
 0x52c   : > { %v908_v43 = vsub.f32 1.0, %v907_v40 }
 0x52d   : > { %v903_v4 = vor.u32 1.1754944e-38, %v902_v62  ;;  %vm901_vm13 = vcmp.eq.f32.partialorder %v900_v0, 8.507059e+37 }
 0x52e   : > { %v909_v46 = vmul.f32 %v1459_v39, %v908_v43 }
 0x530   : > { %v910_v49 = vadd.f32 %v1459_v39, %v909_v46 }
 0x531   : > { %v1461_v51 = vpop.eup %1460 }
 0x532   : > { %v892_v54 = vmul.f32 %v1461_v51, %v884_v41  ;;  %v914_v55 = vsel %vm913_vm8, %v1459_v39, %v910_v49  ;;  %vm897_vm10 = vweird.f32 %v1461_v51 }
 0x533   : > { %v919_v58 = vsel %vm916_vm9, %v918_v53, %v914_v55  ;;  %vm898_vm12 = vmor %vm896_vm11, %vm897_vm10 }
 0x534   : > { %v893_v59 = vsub.f32 1.0, %v892_v54  ;;  %v920_v60 = vmul.f32 %v919_v58, %v878_v52 }
 0x536   : > { %v894_v63 = vmul.f32 %v1461_v51, %v893_v59  ;;  %v922_v1 = vadd.f32 %v920_v60, %v876_v57 }
 0x538   : > { %v895_v3 = vadd.f32 %v1461_v51, %v894_v63  ;;  %962 = vmatmul.f32.vlgmr.msra.gmra.mxu2 %v922_v1 }
 0x53a   : > { %v899_v6 = vsel %vm898_vm12, %v1461_v51, %v895_v3 }
 0x53b   : > { %v904_v8 = vsel %vm901_vm13, %v903_v4, %v899_v6 }
 0x53c   : > { %v905_v9 = vmul.f32 %v904_v8, %v877_v5 }
 0x53e   : > { %v921_v10 = vadd.f32 %v905_v9, %v875_v7 }
 0x540   : > { %959 = vmatmul.f32.vlgmr.msra.gmra.mxu0 %v921_v10 }
 0x5bb   : > { %v963_v15 = vpop.f32.mrf.mxu2 }
 0x5bc   : > { %v964_v16 = vadd.f32 %v1456_v14, %v963_v15 }
 0x5bd   : > { %v960_v17 = vpop.f32.mrf.mxu0 }
 0x5be   : > { %v967_v18 = vmax.f32 %v964_v16, 0.0  ;;  %v961_v19 = vadd.f32 %v1456_v14, %v960_v17 }
 0x5c0   : > { %v966_v20 = vmax.f32 %v961_v19, 0.0  ;;  %1007 = vmatmul.f32.vlgmr.msra.gmra.mxu3 %v967_v18 }
 0x5c2   : > { %1004 = vmatmul.f32.vlgmr.msra.gmra.mxu1 %v966_v20 }
 0x63f   : > { %v1005_v22 = vpop.f32.mrf.mxu1 }
 0x640   : > { %v1006_v23 = vadd.f32 %v1457_v21, %v1005_v22 }
 0x642   : > { %v1011_v24 = vadd.f32 %v1006_v23, %v875_v7 }
 0x643   : > { %v1008_v25 = vpop.f32.mrf.mxu3 }
 0x644   : > { %1013 = vst [vmem:[%s2118_s11] sm:$0xff] %v1011_v24  ;;  %v1009_v26 = vadd.f32 %v1457_v21, %v1008_v25 }
 0x646   : > { %v1012_v27 = vadd.f32 %v1009_v26, %v876_v57 }
 0x648   : > { %1014 = vst [vmem:[%s2118_s11 + $0x8] sm:$0xff] %v1012_v27 }
 0x649 PF: > { %s2270_s28 = sld [smem:[#allocation28_spill]]  ;;  %s1028_s13 = sshll.u32 %s2118_s11, 4  ;;  %s1029_s13 = int_to_ptr.vmem [resolvable:$true] %s1028_s13 }
 0x64a   : > { %s2271_s24 = sld [smem:[#allocation41_spill]]  ;;  %s1016_s3 = scalar_lea.sflag [#allocation9], %s2087_s2 }
 0x64f   : > { %s1225_s19 = sshll.u32 %s2270_s28, 4 }
 0x650   : > { %s1027_s26 = scalar_lea.hbm %s2271_s24, %s1225_s19  ;;  %s1692_s6 = scalar_lea.hbm %s2271_s24, 48 }
 0x651   : > { %s1030_s25 = sshll.u32 %s1027_s26, 4  ;;  %s1031_s25 = int_to_ptr.hbm [resolvable:$true] %s1030_s25 }
 0x652   : > { %s1686_s10 = sshra.s32 %s1031_s25, 4  ;;  %s1687_s10 = int_to_ptr.hbm [resolvable:$true] %s1686_s10 }
 0x653   : > { %s1688_s12 = scalar_lea.hbm %s1687_s10, 16  ;;  %p1693_p8 = scmp.lt.s32.totalorder %s1687_s10, %s2271_s24 }
 0x654   : > { %p1689_p12 = scmp.ne.s32.totalorder %s1687_s10, %s1688_s12  ;;  %p1694_p9 = scmp.lt.s32.totalorder %s1692_s6, %s1688_s12 }
 0x656   : > { %p1690_p2 = pnand %p1689_p12, %p2013_p13  ;;  %p1695_p10 = por %p1694_p9, %p1693_p8 }
 0x658   : > { %p1691_p6 = pneg %p1690_p2 }
 0x65a   : > { %p1696_p11 = pnand %p1695_p10, %p1691_p6 }
 0x65c   : > { %1699 = shalt.err (!%p1696_p11)
}
 0x65d   : > { %s1825_s2 = smov 128   ;;  %s1826_s11 = smov 8  }
 0x65e   : > { %1298 = dma.vmem_to_hbm [thread:$0]  (%p2013_p13), %s1029_s13, 256, %s1031_s25, %s1016_s3, %s1825_s2, %s1825_s2, %s1826_s11  }
 0x65f PF: > { %s2272_s5 = sld [smem:[#allocation26_spill]]  ;;  %p1338_p4 = scmp.ge.s32.totalorder %s1810_s23, 2 }
 0x661   : > { %p1324_p7 = pnand %p1338_p4, %p2017_p0 }
 0x663   : > { %p1325_p5 = pneg %p1324_p7 }
 0x665   : > { %s1045_s28 = sand.u32 1, %s2272_s5  }
 0x666   : > { %s1046_s19 = scalar_lea.sflag [#allocation9], %s1045_s28 }
 0x667   : > { %1765 = dma.done.wait (%p1325_p5), %s1046_s19, 256  }
 0x668   : > { %1767 = vsyncadd (%p1325_p5), %s1046_s19, 4294967040  ;;  %s31_s23 = sadd.s32 1, %s1810_s23   ;;  %s2274_s9 = sld [smem:[#allocation30_spill]] }
 0x669   : > { %p28_p3 = scmp.ge.s32.totalorder %s31_s23, 11   ;;  %s2275_s4 = sld [smem:[#allocation31_spill]] }
 0x66a   : > { %s2276_s13 = smov %s1774_s14  ;;  %s2277_s14 = smov %s1778_s15 }
 0x66b   : > { %s2278_s15 = smov %s2063_s27  ;;  %s2279_s16 = smov %s1786_s17 }
 0x66c   : > { %s2280_s17 = smov %s1790_s18  ;;  %s2281_s18 = smov %s2072_s0 }
 0x66d   : > { %s2282_s19 = smov %s1802_s21  ;;  %s2283_s20 = smov %s1806_s22 }
 0x66e   : > { %s2284_s21 = smov %s2274_s9  ;;  %30 = sbr.rel (!%p28_p3) target bundleno = 24 (0x18), region = 146 }
 0x66f   : > { %s2285_s22 = smov %s2275_s4 }
 0x673   :  { %1052 = vsyncpa [#allocation8], 1 }
 0x674   :  { %1054 = vsyncpa [#allocation8 + $0x1], 1 }
 0x675   :  { %1055 = vsyncpa [#allocation11], 1 }
 0x676   :  { %1057 = vsyncpa [#allocation11 + $0x1], 1 }
 0x677   :  { %1058 = vsyncpa [#allocation14], 1 }
 0x678   :  { %1059 = vsyncpa [#allocation17], 1 }
 0x679   :  { %1060 = vsyncpa [#allocation9], 1 }
 0x67a   :  { %1062 = vsyncpa [#allocation9 + $0x1], 1 }

</bundles_post_ra>
